<compile_context>
chip_gen: v7x
topology: tpu7x:2x2x1
jax: 0.10.0
libtpu: 0.0.40
codegen_flags: <defaults>
</compile_context>

<pallas_src>
import jax
import jax.numpy as jnp
from jax.experimental import pallas as pl
from jax.experimental.pallas import tpu as pltpu

HIDDEN = 128


def policy_kernel(xt_ref, w1_ref, b1_ref, w2_ref, b2_ref, ot_ref):
    xt = xt_ref[...]                                        # (in_size, TB) f32
    # layer 1: h^T = W1 @ x^T + b1      -> (128, TB)
    h = jnp.dot(w1_ref[...], xt, preferred_element_type=jnp.float32) + b1_ref[...]
    h = jnp.maximum(h, 0.0)
    # layer 2: logits^T = W2 @ h^T + b2 -> (out_size, TB), full K=128 on the MXU
    logits = (jnp.dot(w2_ref[...], h, preferred_element_type=jnp.float32)
              + b2_ref[...])
    # softmax over the out_size (sublane) axis == F.softmax(..., dim=1) in the
    # original (batch, out_size) layout.  Exact normalization (no approx vrcp).
    m = jnp.max(logits, axis=0, keepdims=True)              # (1, TB)
    e = jnp.exp(logits - m)                                 # (out_size, TB)
    denom = jnp.sum(e, axis=0, keepdims=True)               # (1, TB)
    ot_ref[...] = (e / denom).astype(ot_ref.dtype)


def _round_up(n, m):
    return ((n + m - 1) // m) * m


def policy_forward(x, w1, b1, w2, b2, *, tb=4096):
    """x: (B, in_size) f32.
    w1: (128, in_size), b1: (128, 1), w2: (out_size, 128), b2: (out_size, 1)
    (natural nn.Linear layouts).  Returns softmax probabilities (B, out_size).
    """
    B, in_size = x.shape
    hidden = w1.shape[0]
    out_size = w2.shape[0]

    # Batch rides the lane axis -> tile must be a multiple of 128.
    tb = max(128, _round_up(int(tb), 128))
    if B > 256:
        # Prefer >= 2 grid steps so v7x's two TensorCores both get work.
        TB = min(tb, _round_up(-(-B // 2), 128))
    else:
        TB = min(tb, _round_up(B, 128))
    Bp = _round_up(B, TB)

    xt = x.T                                                # (in_size, B)
    if Bp != B:
        # Padded columns compute softmax(bias) only; sliced off below.
        xt = jnp.pad(xt, ((0, 0), (0, Bp - B)))
    grid = (Bp // TB,)

    cost = pl.CostEstimate(
        flops=2 * Bp * (in_size * hidden + hidden * out_size),
        transcendentals=Bp * out_size,
        bytes_accessed=4 * (Bp * in_size
                            + hidden * in_size + hidden
                            + out_size * hidden + out_size
                            + Bp * out_size),
    )

    out_t = pl.pallas_call(
        policy_kernel,
        out_shape=jax.ShapeDtypeStruct((out_size, Bp), jnp.float32),
        grid=grid,
        in_specs=[
            # x^T: one lane-dense batch tile per grid step.
            pl.BlockSpec((in_size, TB), lambda i: (0, i)),
            # Weights / biases: constant index_map -> resident in VMEM.
            pl.BlockSpec((hidden, in_size), lambda i: (0, 0)),
            pl.BlockSpec((hidden, 1), lambda i: (0, 0)),
            pl.BlockSpec((out_size, hidden), lambda i: (0, 0)),
            pl.BlockSpec((out_size, 1), lambda i: (0, 0)),
        ],
        # out^T: lane-dense (last dim TB, multiple of 128) -> unmasked stores.
        out_specs=pl.BlockSpec((out_size, TB), lambda i: (0, i)),
        compiler_params=pltpu.CompilerParams(
            dimension_semantics=("parallel",),
        ),
        cost_estimate=cost,
    )(xt, w1, b1, w2, b2)

    return out_t.T[:B]                                      # (B, out_size)


def init_params(key, in_size, out_size, hidden=HIDDEN):
    """Deterministic init mimicking nn.Linear's uniform(-1/sqrt(fan_in), ...)."""
    k1, k2, k3, k4 = jax.random.split(key, 4)
    bound1 = 1.0 / jnp.sqrt(in_size)
    bound2 = 1.0 / jnp.sqrt(hidden)
    w1 = jax.random.uniform(k1, (hidden, in_size), jnp.float32, -bound1, bound1)
    b1 = jax.random.uniform(k2, (hidden, 1), jnp.float32, -bound1, bound1)
    w2 = jax.random.uniform(k3, (out_size, hidden), jnp.float32, -bound2, bound2)
    b2 = jax.random.uniform(k4, (out_size, 1), jnp.float32, -bound2, bound2)
    return w1, b1, w2, b2


def _reference(x, w1, b1, w2, b2):
    h = jnp.maximum(x @ w1.T + b1.T, 0.0)
    return jax.nn.softmax(h @ w2.T + b2.T, axis=1)


if __name__ == "__main__":
    # CartPole-ish shapes: 4 observations -> 2 actions.
    in_size, out_size = 4, 2
    key = jax.random.PRNGKey(0)
    kx1, kx2, kp = jax.random.split(key, 3)
    w1, b1, w2, b2 = init_params(kp, in_size, out_size)

    # --- Small batch (single grid step) ---
    B1 = 8
    x1 = jax.random.normal(kx1, (B1, in_size), jnp.float32)
    out1 = jax.block_until_ready(policy_forward(x1, w1, b1, w2, b2))
    ref1 = _reference(x1, w1, b1, w2, b2)
    assert out1.shape == (B1, out_size)
    assert jnp.allclose(out1, ref1, atol=1e-5, rtol=1e-5)
    assert jnp.allclose(jnp.sum(out1, axis=1), 1.0, atol=1e-5)

    # --- Larger, non-multiple batch (multi-step grid + padding path) ---
    B2 = 300
    x2 = jax.random.normal(kx2, (B2, in_size), jnp.float32)
    out2 = jax.block_until_ready(policy_forward(x2, w1, b1, w2, b2))
    ref2 = _reference(x2, w1, b1, w2, b2)
    assert out2.shape == (B2, out_size)
    assert jnp.allclose(out2, ref2, atol=1e-5, rtol=1e-5)
    assert jnp.allclose(jnp.sum(out2, axis=1), 1.0, atol=1e-5)

    print("KERNEL_OK")
</pallas_src>

<mosaic_0001>
module attributes {stable_mosaic.version = 11 : i64} {
  func.func @policy_kernel(%arg0: i32, %arg1: memref<4x128xf32, #tpu.memory_space<vmem>>, %arg2: memref<128x4xf32, #tpu.memory_space<vmem>>, %arg3: memref<128x1xf32, #tpu.memory_space<vmem>>, %arg4: memref<2x128xf32, #tpu.memory_space<vmem>>, %arg5: memref<2x1xf32, #tpu.memory_space<vmem>>, %arg6: memref<2x128xf32, #tpu.memory_space<vmem>>) attributes {dimension_semantics = [#tpu.dimension_semantics<parallel>], iteration_bounds = array<i64: 1>, scalar_prefetch = 0 : i64, scratch_operands = 0 : i64, tpu.core_type = #tpu.core_type<tc>, window_params = [{transform_indices = @transform_0, window_bounds = array<i64: 4, 128>}, {pipeline_mode = #tpu.pipeline_mode<synchronous>, transform_indices = @transform_1, window_bounds = array<i64: 128, 4>}, {pipeline_mode = #tpu.pipeline_mode<synchronous>, transform_indices = @transform_2, window_bounds = array<i64: 128, 1>}, {pipeline_mode = #tpu.pipeline_mode<synchronous>, transform_indices = @transform_3, window_bounds = array<i64: 2, 128>}, {pipeline_mode = #tpu.pipeline_mode<synchronous>, transform_indices = @transform_4, window_bounds = array<i64: 2, 1>}, {transform_indices = @transform_5, window_bounds = array<i64: 2, 128>}]} {
    %c0 = arith.constant 0 : index
    %c0_0 = arith.constant 0 : index
    %0 = vector.load %arg1[%c0, %c0_0] : memref<4x128xf32, #tpu.memory_space<vmem>>, vector<4x128xf32>
    %c0_1 = arith.constant 0 : index
    %c0_2 = arith.constant 0 : index
    %1 = vector.load %arg2[%c0_1, %c0_2] : memref<128x4xf32, #tpu.memory_space<vmem>>, vector<128x4xf32>
    %cst = arith.constant dense<0.000000e+00> : vector<128x128xf32>
    %2 = tpu.matmul %1, %0, %cst {dimension_numbers = #tpu.dot_dimension_numbers<[1], [0], [0], [1], [0, 0, 1, 1], [], []>} : vector<128x4xf32>, vector<4x128xf32>, vector<128x128xf32> -> vector<128x128xf32>
    %c0_3 = arith.constant 0 : index
    %c0_4 = arith.constant 0 : index
    %3 = vector.load %arg3[%c0_3, %c0_4] : memref<128x1xf32, #tpu.memory_space<vmem>>, vector<128x1xf32>
    %4 = vector.broadcast %3 : vector<128x1xf32> to vector<128x128xf32>
    %5 = arith.addf %2, %4 : vector<128x128xf32>
    %cst_5 = arith.constant 0.000000e+00 : f32
    %6 = vector.broadcast %cst_5 : f32 to vector<128x128xf32>
    %7 = arith.maximumf %5, %6 : vector<128x128xf32>
    %c0_6 = arith.constant 0 : index
    %c0_7 = arith.constant 0 : index
    %8 = vector.load %arg4[%c0_6, %c0_7] : memref<2x128xf32, #tpu.memory_space<vmem>>, vector<2x128xf32>
    %cst_8 = arith.constant dense<0.000000e+00> : vector<2x128xf32>
    %9 = tpu.matmul %8, %7, %cst_8 {dimension_numbers = #tpu.dot_dimension_numbers<[1], [0], [0], [1], [0, 0, 1, 1], [], []>} : vector<2x128xf32>, vector<128x128xf32>, vector<2x128xf32> -> vector<2x128xf32>
    %c0_9 = arith.constant 0 : index
    %c0_10 = arith.constant 0 : index
    %10 = vector.load %arg5[%c0_9, %c0_10] : memref<2x1xf32, #tpu.memory_space<vmem>>, vector<2x1xf32>
    %11 = vector.broadcast %10 : vector<2x1xf32> to vector<2x128xf32>
    %12 = arith.addf %9, %11 : vector<2x128xf32>
    %cst_11 = arith.constant dense<0xFF800000> : vector<128xf32>
    %13 = vector.multi_reduction <maximumf>, %12, %cst_11 [0] : vector<2x128xf32> to vector<128xf32>
    %14 = vector.shape_cast %13 : vector<128xf32> to vector<1x128xf32>
    %15 = vector.broadcast %14 : vector<1x128xf32> to vector<2x128xf32>
    %16 = arith.subf %12, %15 : vector<2x128xf32>
    %17 = math.exp %16 : vector<2x128xf32>
    %cst_12 = arith.constant dense<0.000000e+00> : vector<128xf32>
    %18 = vector.multi_reduction <add>, %17, %cst_12 [0] : vector<2x128xf32> to vector<128xf32>
    %19 = vector.shape_cast %18 : vector<128xf32> to vector<1x128xf32>
    %20 = vector.broadcast %19 : vector<1x128xf32> to vector<2x128xf32>
    %21 = arith.divf %17, %20 : vector<2x128xf32>
    %c0_13 = arith.constant 0 : index
    %c0_14 = arith.constant 0 : index
    %22 = vector.load %arg6[%c0_13, %c0_14] : memref<2x128xf32, #tpu.memory_space<vmem>>, vector<2x128xf32>
    tpu.vector_store %arg6[%c0_13, %c0_14], %21 {strides = array<i32>} : memref<2x128xf32, #tpu.memory_space<vmem>>, vector<2x128xf32>,
    return
  }
  func.func @transform_0(%arg0: i32) -> (i32, i32) {
    %c0_i32 = arith.constant 0 : i32
    %c0_i32_0 = arith.constant 0 : i32
    return %c0_i32, %arg0 : i32, i32
  }
  func.func @transform_1(%arg0: i32) -> (i32, i32) {
    %c0_i32 = arith.constant 0 : i32
    %c0_i32_0 = arith.constant 0 : i32
    %c0_i32_1 = arith.constant 0 : i32
    return %c0_i32, %c0_i32_0 : i32, i32
  }
  func.func @transform_2(%arg0: i32) -> (i32, i32) {
    %c0_i32 = arith.constant 0 : i32
    %c0_i32_0 = arith.constant 0 : i32
    %c0_i32_1 = arith.constant 0 : i32
    return %c0_i32, %c0_i32_0 : i32, i32
  }
  func.func @transform_3(%arg0: i32) -> (i32, i32) {
    %c0_i32 = arith.constant 0 : i32
    %c0_i32_0 = arith.constant 0 : i32
    %c0_i32_1 = arith.constant 0 : i32
    return %c0_i32, %c0_i32_0 : i32, i32
  }
  func.func @transform_4(%arg0: i32) -> (i32, i32) {
    %c0_i32 = arith.constant 0 : i32
    %c0_i32_0 = arith.constant 0 : i32
    %c0_i32_1 = arith.constant 0 : i32
    return %c0_i32, %c0_i32_0 : i32, i32
  }
  func.func @transform_5(%arg0: i32) -> (i32, i32) {
    %c0_i32 = arith.constant 0 : i32
    %c0_i32_0 = arith.constant 0 : i32
    return %c0_i32, %arg0 : i32, i32
  }
}

</mosaic_0001>

<bundles_post_ra>
// kernel: tpu_custom_call.1
= control target key start
LH: loop header
LB: loop body
LE: loop exit
PB: predicated region body
PF: predicated region fallthrough
CT: control target
= control target key end

     0   :  { %vm183_vm0 = vcmask 1043456   ;;  %vm134_vm1 = vcmask 31744   ;;  %v631_v4 = vmov 0   ;;  %s807_s0 = inlined_call_operand.vmem [shape: f32[4,128], index: 0, kind: input, shape index: {}]   ;;  %s808_s1 = inlined_call_operand.vmem [shape: f32[128,4], index: 1, kind: input, shape index: {}]   ;;  %s809_s2 = inlined_call_operand.vmem [shape: f32[128,1], index: 2, kind: input, shape index: {}]   ;;  %s810_s3 = inlined_call_operand.vmem [shape: f32[2,128], index: 3, kind: input, shape index: {}]   ;;  %s811_s4 = inlined_call_operand.vmem [shape: f32[2,1], index: 4, kind: input, shape index: {}]   ;;  %s812_s5 = inlined_call_operand.hbm [shape: f32[2,128], index: 5, kind: output, shape index: {}]  }
   0x1   :  { %v21_v0 = vld [vmem:[%s807_s0] sm:$0xf]  ;;  %v23_v2 = vld [vmem:[%s808_s1 + $0x8] sm:$0xff]  ;;  %v24_v3 = vld [vmem:[%s808_s1 + $0x10] sm:$0xff]  ;;  %601 = vset.pattern.permute.xlu0 %v631_v4  ;;  %602 = vset.pattern.permute.xlu1 %v631_v4 }
   0x2   :  { %v22_v1 = vld [vmem:[%s808_s1] sm:$0xff]  ;;  %511 = vmatprep.subr.msk.mxu0 %vm183_vm0, %v21_v0  ;;  %v25_v5 = vld [vmem:[%s808_s1 + $0x18] sm:$0xff]  ;;  %v40_v8 = vld [vmem:[%s809_s2 + $0x10] sm:$0xff] }
   0x3   :  { %513 = vmatprep.mubr.msk.f32.mxu0 %vm134_vm1, %v22_v1  ;;  %512 = vmatpush3.msk.msra.mxu0 %vm183_vm0, %v21_v0  ;;  %v26_v6 = vld [vmem:[%s808_s1 + $0x20] sm:$0xff]  ;;  %v39_v9 = vld [vmem:[%s809_s2 + $0x8] sm:$0xff]  ;;  %v41_v11 = vld [vmem:[%s809_s2 + $0x18] sm:$0xff] }
   0x4   :  { %514 = vmatmul.mubr.msk.f32.vlgmr.msra.gmra.mrb[0].mxu0 %vm134_vm1, %v23_v2  ;;  %v38_v7 = vld [vmem:[%s809_s2] sm:$0xff]  ;;  %66 = vperm.xlu1 %602, %v40_v8   ;;  %v27_v10 = vld [vmem:[%s808_s1 + $0x28] sm:$0xff]  ;;  %v28_v12 = vld [vmem:[%s808_s1 + $0x30] sm:$0xff] }
   0x5   :  { %516 = vmatprep.mubr.msk.f32.mxu0 %vm134_vm1, %v24_v3  ;;  %56 = vperm.xlu0 %601, %v38_v7   ;;  %v42_v13 = vld [vmem:[%s809_s2 + $0x20] sm:$0xff] }
   0x8   :  { %517 = vmatmul.mubr.msk.f32.gmra.mrb[2].mxu0 %vm134_vm1, %v25_v5  ;;  %71 = vperm.xlu1 %602, %v41_v11  }
   0x9   :  { %519 = vmatprep.mubr.msk.f32.mxu0 %vm134_vm1, %v26_v6  ;;  %61 = vperm.xlu0 %601, %v39_v9  }
   0xc   :  { %520 = vmatmul.mubr.msk.f32.gmra.mrb[4].mxu0 %vm134_vm1, %v27_v10 }
   0xd   :  { %10 = vsyncpa [#allocation3], 0  ;;  %522 = vmatprep.mubr.msk.f32.mxu0 %vm134_vm1, %v28_v12  ;;  %v29_v14 = vld [vmem:[%s808_s1 + $0x38] sm:$0xff]  ;;  %v43_v15 = vld [vmem:[%s809_s2 + $0x28] sm:$0xff]  ;;  %76 = vperm.xlu0 %601, %v42_v13   ;;  %v632_v35 = vmov 0.0|0.0   ;;  %vm633_vm2 = vmmov 0  }
   0xe   :  { %v30_v16 = vld [vmem:[%s808_s1 + $0x40] sm:$0xff]  ;;  %v44_v17 = vld [vmem:[%s809_s2 + $0x30] sm:$0xff]  ;;  %81 = vperm.xlu1 %602, %v43_v15   ;;  %v31_v18 = vld [vmem:[%s808_s1 + $0x48] sm:$0xff]  ;;  %572 = vmatprep.subr.bf16.mxu1 %v632_v35  ;;  %v634_v36 = vmov 0.0   ;;  %vm425_vm3 = vcmask 1041408  }
   0xf   :  { %v45_v19 = vld [vmem:[%s809_s2 + $0x38] sm:$0xff]  ;;  %v32_v20 = vld [vmem:[%s808_s1 + $0x50] sm:$0xff]  ;;  %v46_v21 = vld [vmem:[%s809_s2 + $0x40] sm:$0xff]  ;;  %569 = vmatprep.mubr.msk.f32.mxu1 %vm633_vm2, %v634_v36 }
  0x10   :  { %523 = vmatmul.mubr.msk.f32.gmra.mrb[6].mxu0 %vm134_vm1, %v29_v14  ;;  %v33_v22 = vld [vmem:[%s808_s1 + $0x58] sm:$0xff]  ;;  %v47_v23 = vld [vmem:[%s809_s2 + $0x48] sm:$0xff]  ;;  %v34_v24 = vld [vmem:[%s808_s1 + $0x60] sm:$0xff] }
  0x11   :  { %525 = vmatprep.mubr.msk.f32.mxu0 %vm134_vm1, %v30_v16  ;;  %86 = vperm.xlu0 %601, %v44_v17   ;;  %v48_v25 = vld [vmem:[%s809_s2 + $0x50] sm:$0xff]  ;;  %v35_v26 = vld [vmem:[%s808_s1 + $0x68] sm:$0xff]  ;;  %v49_v27 = vld [vmem:[%s809_s2 + $0x58] sm:$0xff] }
  0x12   :  { %91 = vperm.xlu1 %602, %v45_v19   ;;  %v36_v28 = vld [vmem:[%s808_s1 + $0x70] sm:$0xff]  ;;  %v50_v29 = vld [vmem:[%s809_s2 + $0x60] sm:$0xff]  ;;  %v37_v30 = vld [vmem:[%s808_s1 + $0x78] sm:$0xff] }
  0x13   :  { %v51_v31 = vld [vmem:[%s809_s2 + $0x68] sm:$0xff]  ;;  %v52_v32 = vld [vmem:[%s809_s2 + $0x70] sm:$0xff]  ;;  %v53_v33 = vld [vmem:[%s809_s2 + $0x78] sm:$0xff] }
  0x14   :  { %526 = vmatmul.mubr.msk.f32.gmra.mrb[8].mxu0 %vm134_vm1, %v31_v18  ;;  %v349_v34 = vld [vmem:[%s811_s4] sm:$0x3] }
  0x15   :  { %528 = vmatprep.mubr.msk.f32.mxu0 %vm134_vm1, %v32_v20  ;;  %96 = vperm.xlu0 %601, %v46_v21  }
  0x16   :  { %101 = vperm.xlu1 %602, %v47_v23  }
  0x18   :  { %529 = vmatmul.mubr.msk.f32.gmra.mrb[10].mxu0 %vm134_vm1, %v33_v22 }
  0x19   :  { %531 = vmatprep.mubr.msk.f32.mxu0 %vm134_vm1, %v34_v24  ;;  %106 = vperm.xlu0 %601, %v48_v25  }
  0x1a   :  { %111 = vperm.xlu1 %602, %v49_v27  }
  0x1c   :  { %532 = vmatmul.mubr.msk.f32.gmra.mrb[12].mxu0 %vm134_vm1, %v35_v26 }
  0x1d   :  { %534 = vmatprep.mubr.msk.f32.mxu0 %vm134_vm1, %v36_v28  ;;  %116 = vperm.xlu0 %601, %v50_v29  }
  0x1e   :  { %121 = vperm.xlu1 %602, %v51_v31  }
  0x20   :  { %535 = vmatmul.mubr.msk.f32.gmra.mrb[14].mxu0 %vm134_vm1, %v37_v30 }
  0x21   :  { %126 = vperm.xlu0 %601, %v52_v32  }
  0x22   :  { %131 = vperm.xlu1 %602, %v53_v33  }
  0x25   :  { %352 = vperm.xlu0 %601, %v349_v34  }
  0x83   :  { %v67_v37 = vpop.permute.xlu1 %66 }
  0x84   :  { %v57_v38 = vpop.permute.xlu0 %56 }
  0x87   :  { %v72_v39 = vpop.permute.xlu1 %71 }
  0x88   :  { %v62_v40 = vpop.permute.xlu0 %61 }
  0x8c   :  { %v77_v42 = vpop.permute.xlu0 %76 }
  0x8d   :  { %v82_v41 = vpop.permute.xlu1 %81 }
  0x90   :  { %v87_v51 = vpop.permute.xlu0 %86 }
  0x91   :  { %v92_v48 = vpop.permute.xlu1 %91 }
  0x94   :  { %v97_v0 = vpop.permute.xlu0 %96 }
  0x95   :  { %v102_v61 = vpop.permute.xlu1 %101 }
  0x98   :  { %v107_v12 = vpop.permute.xlu0 %106 }
  0x99   :  { %v112_v9 = vpop.permute.xlu1 %111 }
  0x9c   :  { %v117_v25 = vpop.permute.xlu0 %116 }
  0x9d   :  { %v122_v22 = vpop.permute.xlu1 %121 }
  0xa1   :  { %v132_v34 = vpop.permute.xlu1 %131 }
  0xd7   :  { %v515_v43 = vpop.f32.mrb[0].mxu0 }
  0xd8   :  { %v259_v44 = vadd.f32 %v515_v43, %v62_v40  ;;  %v253_v45 = vpop.f32.mrb[1].mxu0 }
  0xd9   :  { %v254_v46 = vadd.f32 %v253_v45, %v57_v38  ;;  %v127_v38 = vpop.permute.xlu0 %126 }
  0xda   :  { %v333_v47 = vmax.f32 %v259_v44, 0.0 }
  0xdb   :  { %v332_v49 = vmax.f32 %v254_v46, 0.0  ;;  %v518_v50 = vpop.f32.mrb[2].mxu0  ;;  %v348_v46 = vld [vmem:[%s810_s3] sm:$0x3]  ;;  %s635_s3 = smov [#allocation2]  }
  0xdc   :  { %v269_v52 = vadd.f32 %v518_v50, %v72_v39  ;;  %v263_v53 = vpop.f32.mrb[3].mxu0  ;;  %s452_s4 = sshll.u32 %s635_s3, 4  ;;  %s453_s4 = int_to_ptr.vmem [resolvable:$true] %s452_s4 }
  0xdd   :  { %v264_v54 = vadd.f32 %v263_v53, %v67_v37  ;;  %v573_v55 = vpack.c.bf16 %v333_v47, %v332_v49  ;;  %v353_v47 = vpop.permute.xlu0 %352  ;;  %s607_s8 = scalar_lea.vmem %s453_s4, 32  ;;  %p612_p1 = scmp.lt.s32.totalorder %s453_s4, %s453_s4 }
  0xde   :  { %v335_v56 = vmax.f32 %v269_v52, 0.0  ;;  %p608_p0 = scmp.ne.s32.totalorder %s453_s4, %s607_s8  ;;  %p613_p2 = scmp.lt.s32.totalorder %s607_s8, %s607_s8 }
  0xdf   :  { %v334_v57 = vmax.f32 %v264_v54, 0.0  ;;  %v521_v58 = vpop.f32.mrb[4].mxu0  ;;  %574 = vmatpush3.bf16.msra.mxu1 %v573_v55 }
  0xe0   :  { %v279_v59 = vadd.f32 %v521_v58, %v82_v41  ;;  %v273_v60 = vpop.f32.mrb[5].mxu0  ;;  %575 = vmatprep.subr.bf16.mxu1 %v632_v35  ;;  %p614_p3 = por %p613_p2, %p612_p1 }
  0xe1   :  { %v576_v62 = vpack.c.bf16 %v335_v56, %v334_v57  ;;  %v274_v63 = vadd.f32 %v273_v60, %v77_v42 }
  0xe2   :  { %v337_v1 = vmax.f32 %v279_v59, 0.0  ;;  %p615_p4 = pnand %p614_p3, %p608_p0 }
  0xe3   :  { %v336_v2 = vmax.f32 %v274_v63, 0.0  ;;  %v524_v3 = vpop.f32.mrb[6].mxu0  ;;  %577 = vmatpush3.bf16.msra.mxu1 %v576_v62 }
  0xe4   :  { %v289_v4 = vadd.f32 %v524_v3, %v92_v48  ;;  %v283_v5 = vpop.f32.mrb[7].mxu0  ;;  %578 = vmatprep.subr.bf16.mxu1 %v632_v35 }
  0xe5   :  { %v579_v6 = vpack.c.bf16 %v337_v1, %v336_v2  ;;  %v284_v7 = vadd.f32 %v283_v5, %v87_v51 }
  0xe6   :  { %v339_v8 = vmax.f32 %v289_v4, 0.0 }
  0xe7   :  { %v338_v10 = vmax.f32 %v284_v7, 0.0  ;;  %v527_v11 = vpop.f32.mrb[8].mxu0  ;;  %580 = vmatpush3.bf16.msra.mxu1 %v579_v6 }
  0xe8   :  { %v299_v13 = vadd.f32 %v527_v11, %v102_v61  ;;  %v293_v14 = vpop.f32.mrb[9].mxu0  ;;  %581 = vmatprep.subr.bf16.mxu1 %v632_v35 }
  0xe9   :  { %v582_v15 = vpack.c.bf16 %v339_v8, %v338_v10  ;;  %v294_v16 = vadd.f32 %v293_v14, %v97_v0 }
  0xea   :  { %v341_v17 = vmax.f32 %v299_v13, 0.0 }
  0xeb   :  { %v340_v18 = vmax.f32 %v294_v16, 0.0  ;;  %v530_v19 = vpop.f32.mrb[10].mxu0  ;;  %583 = vmatpush3.bf16.msra.mxu1 %v582_v15 }
  0xec   :  { %v309_v20 = vadd.f32 %v530_v19, %v112_v9  ;;  %v303_v21 = vpop.f32.mrb[11].mxu0  ;;  %584 = vmatprep.subr.bf16.mxu1 %v632_v35 }
  0xed   :  { %v585_v23 = vpack.c.bf16 %v341_v17, %v340_v18  ;;  %v304_v24 = vadd.f32 %v303_v21, %v107_v12 }
  0xee   :  { %v343_v26 = vmax.f32 %v309_v20, 0.0 }
  0xef   :  { %v342_v27 = vmax.f32 %v304_v24, 0.0  ;;  %v533_v28 = vpop.f32.mrb[12].mxu0  ;;  %586 = vmatpush3.bf16.msra.mxu1 %v585_v23 }
  0xf0   :  { %v319_v29 = vadd.f32 %v533_v28, %v122_v22  ;;  %v313_v30 = vpop.f32.mrb[13].mxu0  ;;  %587 = vmatprep.subr.bf16.mxu1 %v632_v35 }
  0xf1   :  { %v588_v31 = vpack.c.bf16 %v343_v26, %v342_v27  ;;  %v314_v32 = vadd.f32 %v313_v30, %v117_v25 }
  0xf2   :  { %v345_v33 = vmax.f32 %v319_v29, 0.0 }
  0xf3   :  { %v344_v36 = vmax.f32 %v314_v32, 0.0  ;;  %v536_v37 = vpop.f32.mrb[14].mxu0  ;;  %589 = vmatpush3.bf16.msra.mxu1 %v588_v31 }
  0xf4   :  { %v329_v39 = vadd.f32 %v536_v37, %v132_v34  ;;  %v323_v40 = vpop.f32.mrb[15].mxu0  ;;  %590 = vmatprep.subr.bf16.mxu1 %v632_v35 }
  0xf5   :  { %v591_v41 = vpack.c.bf16 %v345_v33, %v344_v36  ;;  %v324_v42 = vadd.f32 %v323_v40, %v127_v38 }
  0xf6   :  { %v347_v43 = vmax.f32 %v329_v39, 0.0 }
  0xf7   :  { %v346_v44 = vmax.f32 %v324_v42, 0.0  ;;  %592 = vmatpush3.bf16.msra.mxu1 %v591_v41 }
  0xf8   :  { %593 = vmatprep.subr.bf16.mxu1 %v632_v35 }
  0xf9   :  { %v594_v45 = vpack.c.bf16 %v347_v43, %v346_v44 }
  0xfb   :  { %595 = vmatpush3.bf16.msra.mxu1 %v594_v45 }
  0xfe   :  { %570 = vmatmul.mubr.f32.vlgmr.msra.gmra.mrb[0].mxu1 %v348_v46 }
 0x1d1   :  { %v421_v48 = vpop.f32.mrb[0].mxu1 }
 0x1d2   :  { %v422_v49 = vadd.f32 %v421_v48, %v353_v47  ;;  %v571_v50 = vpop.f32.mrb[1].mxu1 }
 0x1d4   :  { %v426_v51 = vsel %vm425_vm3, %v422_v49, -inf }
 0x1d5   :  { %v427_v52 = vrot.slane %v426_v51, 4 }
 0x1d7   :  { %v428_v53 = vmax.f32 %v426_v51, %v427_v52 }
 0x1d9   :  { %v429_v54 = vrot.slane %v428_v53, 2 }
 0x1db   :  { %v430_v55 = vmax.f32 %v428_v53, %v429_v54 }
 0x1dd   :  { %v431_v56 = vrot.slane %v430_v55, 1 }
 0x1df   :  { %v432_v57 = vmax.f32 %v430_v55, %v431_v56 }
 0x1e1   :  { %v433_v35 = vsub.f32 %v422_v49, %v432_v57 }
 0x1e3   :  { %v434_v58 = vmul.f32 1.442695, %v433_v35 }
 0x1e5   :  { %603 = vpow2.f32 %v434_v58 }
 0x1ef   :  { %v604_v59 = vpop.eup %603 }
 0x1f0   :  { %v436_v60 = vsel %vm425_vm3, %v604_v59, 0.0 }
 0x1f1   :  { %v437_v61 = vrot.slane %v436_v60, 4 }
 0x1f3   :  { %v438_v62 = vadd.f32 %v437_v61, %v436_v60 }
 0x1f5   :  { %v439_v63 = vrot.slane %v438_v62, 2 }
 0x1f7   :  { %v440_v0 = vadd.f32 %v439_v63, %v438_v62 }
 0x1f9   :  { %v441_v1 = vrot.slane %v440_v0, 1 }
 0x1fb   :  { %v442_v2 = vadd.f32 %v441_v1, %v440_v0 }
 0x1fd   :  { %605 = vrcp.f32 %v442_v2 }
 0x207   :  { %v606_v3 = vpop.eup %605 }
 0x208   :  { %v444_v4 = vmul.f32 %v606_v3, %v604_v59 }
 0x20a   :  { %445 = vst [vmem:[#allocation2] sm:$0x3] %v444_v4 }
 0x20b   :  { %618 = shalt.err (!%p615_p4)
}
 0x20c   :  { %s619_s11 = scalar_lea.hbm %s812_s5, 32 }
 0x20d   :  { %p620_p5 = scmp.ne.s32.totalorder %s812_s5, %s619_s11  ;;  %p623_p6 = scmp.lt.u32.totalorder %s619_s11, %s812_s5 }
 0x20f   :  { %p625_p7 = pnand %p623_p6, %p620_p5 }
 0x211   :  { %628 = shalt.err (!%p625_p7)
}
 0x212   :  { %455 = dma.vmem_to_hbm [thread:$0]  %s453_s4, 32, %s812_s5, [#allocation3]  }
 0x213   :  { %629 = dma.done.wait [#allocation3], 32  }
 0x214   :  { %630 = vsyncadd [#allocation3], 4294967264 }
 0x215   :  { %459 = vsyncpa [#allocation3], 1 }

</bundles_post_ra>
